<compile_context>
chip_gen: v7x
topology: tpu7x:2x2x1
jax: 0.10.0
libtpu: 0.0.40
codegen_flags: <defaults>
</compile_context>

<pallas_src>
import functools

import jax
import jax.numpy as jnp
from jax import lax
from jax.experimental import pallas as pl
from jax.experimental.pallas import tpu as pltpu

EPS = 1e-5  # BatchNorm2d default eps


# ------------------------------ Pallas kernel -------------------------------

def _conv_bn_relu_kernel(x_ref, w_ref, b_ref, o_ref, *, k, h_out, w_out):
    """Fused direct conv + folded-BN bias + ReLU for one (image, Cout-tile).

    x_ref: (1, h_out+k-1, w_out+k-1, Cin)  bf16  (spatially pre-padded)
    w_ref: (k*k, Cin, Cout_tile)           bf16  (BN scale folded in)
    b_ref: (1, Cout_tile)                  f32   (conv bias + BN shift folded in)
    o_ref: (1, h_out, w_out, Cout_tile)    f32
    """
    cout = o_ref.shape[-1]
    acc = jnp.zeros((h_out * w_out, cout), jnp.float32)
    # Static unroll over the k*k taps: each tap is a shifted window of the
    # VMEM-resident input block -> (h*w, Cin) @ (Cin, Cout) on the MXU with
    # f32 accumulation. No im2col matrix ever touches HBM.
    for dh in range(k):
        for dw in range(k):
            xs = x_ref[0, dh:dh + h_out, dw:dw + w_out, :]      # (h_out, w_out, Cin)
            lhs = xs.reshape(h_out * w_out, xs.shape[-1])       # layout no-op
            acc = acc + jnp.dot(lhs, w_ref[dh * k + dw],
                                preferred_element_type=jnp.float32)
    out = jnp.maximum(acc + b_ref[...], 0.0)                    # bias + ReLU epilogue
    o_ref[0] = out.reshape(h_out, w_out, cout)


# ------------------------------ wrappers -------------------------------------

def convblock_apply_nhwc(x_nhwc, p, *, kernel_size, padding):
    """Conv2d(kernel_size, stride=1, padding) + BatchNorm2d(eval) + ReLU, NHWC."""
    # TODO(synk): stride > 1, dilation and groups are not implemented.
    n, h, w, cin = x_nhwc.shape
    k, pad = kernel_size, padding
    cout = p["w"].shape[0]
    h_out = h + 2 * pad - k + 1
    w_out = w + 2 * pad - k + 1
    assert h_out > 0 and w_out > 0

    # Round output width up to a bf16 sublane tile (16) so the in-kernel
    # (h, w, c) <-> (h*w, c) reshapes are pure relabelings; extra columns read
    # zero padding and are sliced off below (no-op when already aligned).
    w_out_p = ((w_out + 15) // 16) * 16
    hp = h_out + k - 1                       # = h + 2*pad
    wp = w_out_p + k - 1

    # Fold BatchNorm (running stats) and the conv bias into weights/bias (f32),
    # then cast weights to bf16 for the MXU.
    scale = p["gamma"] * lax.rsqrt(p["var"] + EPS)
    w_eff = jnp.transpose(p["w"], (2, 3, 1, 0)) * scale          # (kh, kw, Cin, Cout)
    w_eff = w_eff.reshape(k * k, cin, cout).astype(jnp.bfloat16)
    b_eff = ((p["b"] - p["mean"]) * scale + p["beta"]).reshape(1, cout)

    # bf16 activations: native MXU dtype and half the DMA bytes. (In a full
    # network keep activations bf16/NHWC end-to-end instead of per-block casts.)
    xp = jnp.pad(x_nhwc, ((0, 0), (pad, pad), (pad, wp - w - pad), (0, 0)))
    xp = xp.astype(jnp.bfloat16)

    # Cout tiling: whole Cout when it fits one lane tile, else 128-wide tiles.
    tn = cout if cout <= 128 else 128
    assert cout % tn == 0

    out = pl.pallas_call(
        functools.partial(_conv_bn_relu_kernel, k=k, h_out=h_out, w_out=w_out_p),
        out_shape=jax.ShapeDtypeStruct((n, h_out, w_out_p, cout), jnp.float32),
        grid=(n, cout // tn),
        in_specs=[
            pl.BlockSpec((1, hp, wp, cin), lambda i, j: (i, 0, 0, 0)),
            pl.BlockSpec((k * k, cin, tn), lambda i, j: (0, 0, j)),
            pl.BlockSpec((1, tn), lambda i, j: (0, j)),
        ],
        out_specs=pl.BlockSpec((1, h_out, w_out_p, tn), lambda i, j: (i, 0, 0, j)),
        compiler_params=pltpu.CompilerParams(
            dimension_semantics=("parallel", "parallel"),
            # Explicit VMEM budget; keep headroom for v7x's 64 MiB physical VMEM.
            vmem_limit_bytes=64 * 1024 * 1024),
    )(xp, w_eff, b_eff)

    return out[:, :, :w_out, :] if w_out_p != w_out else out


def convblock_forward(x_nchw, p, *, kernel_size, padding):
    """PyTorch-facing ConvBlock.forward: NCHW in, NCHW out.

    The NCHW<->NHWC transposes exist only to honor the nn.Module contract; in a
    full network keep activations NHWC end-to-end and call convblock_apply_nhwc
    directly to avoid two full HBM passes per block.
    """
    x = jnp.transpose(x_nchw, (0, 2, 3, 1))
    y = convblock_apply_nhwc(x, p, kernel_size=kernel_size, padding=padding)
    return jnp.transpose(y, (0, 3, 1, 2))


# ------------------------------ parameters -----------------------------------

def init_convblock(key, cin, cout, k):
    """Deterministic synthetic parameters for Conv2d(bias=True) + BatchNorm2d."""
    # TODO(synk): BatchNorm is applied in inference mode (running stats);
    # PyTorch training-mode batch statistics are not reproduced.
    kw, kb, kg, kbe, km, kv = jax.random.split(key, 6)
    return dict(
        w=0.1 * jax.random.normal(kw, (cout, cin, k, k), jnp.float32),   # OIHW
        b=0.1 * jax.random.normal(kb, (cout,), jnp.float32),
        gamma=1.0 + 0.1 * jax.random.normal(kg, (cout,), jnp.float32),
        beta=0.1 * jax.random.normal(kbe, (cout,), jnp.float32),
        mean=0.1 * jax.random.normal(km, (cout,), jnp.float32),
        var=0.5 + jax.random.uniform(kv, (cout,), jnp.float32),
    )


# ------------------------------ pure-JAX reference ---------------------------

def ref_convblock(x_nchw, p, *, kernel_size, padding):
    del kernel_size  # implied by weight shape
    y = lax.conv_general_dilated(
        x_nchw, p["w"], window_strides=(1, 1),
        padding=[(padding, padding), (padding, padding)],
        dimension_numbers=("NCHW", "OIHW", "NCHW"),
        precision=lax.Precision.HIGHEST)
    c = lambda v: v[None, :, None, None]
    scale = p["gamma"] / jnp.sqrt(p["var"] + EPS)
    y = (y + c(p["b"]) - c(p["mean"])) * c(scale) + c(p["beta"])
    return jnp.maximum(y, 0.0)


# ----------------------------------- main -------------------------------------

if __name__ == "__main__":
    key = jax.random.PRNGKey(0)
    kx, k1, k3, k5 = jax.random.split(key, 4)

    n, cin, h, w = 2, 4, 16, 16
    x = jax.random.normal(kx, (n, cin, h, w), jnp.float32)   # NCHW, like nn.Conv2d

    # The three ConvBlock configurations used inside a GoogLeNet Inception block.
    configs = [
        ("1x1", k1, 8, 1, 0),
        ("3x3", k3, 8, 3, 1),
        ("5x5", k5, 8, 5, 2),
    ]
    for name, kparam, cout, ksz, pad in configs:
        params = init_convblock(kparam, cin, cout, ksz)
        out = jax.block_until_ready(
            convblock_forward(x, params, kernel_size=ksz, padding=pad))
        assert out.shape == (n, cout, h, w), (name, out.shape)
        ref = ref_convblock(x, params, kernel_size=ksz, padding=pad)
        max_err = float(jnp.max(jnp.abs(out - ref)))
        # bf16 operands / f32 accumulation vs. an f32 HIGHEST-precision reference.
        assert max_err < 2e-2, f"{name}: max abs error {max_err}"

    print("KERNEL_OK")
</pallas_src>

<mosaic_0001>
module attributes {stable_mosaic.version = 11 : i64} {
  func.func @_conv_bn_relu_kernel(%arg0: i32, %arg1: i32, %arg2: memref<1x16x16x4xbf16, #tpu.memory_space<vmem>>, %arg3: memref<1x4x8xbf16, #tpu.memory_space<vmem>>, %arg4: memref<1x8xf32, #tpu.memory_space<vmem>>, %arg5: memref<1x16x16x8xf32, #tpu.memory_space<vmem>>) attributes {dimension_semantics = [#tpu.dimension_semantics<parallel>, #tpu.dimension_semantics<parallel>], iteration_bounds = array<i64: 2, 1>, scalar_prefetch = 0 : i64, scratch_operands = 0 : i64, tpu.core_type = #tpu.core_type<tc>, window_params = [{transform_indices = @transform_0, window_bounds = array<i64: 1, 16, 16, 4>}, {transform_indices = @transform_1, window_bounds = array<i64: 1, 4, 8>}, {transform_indices = @transform_2, window_bounds = array<i64: 1, 8>}, {transform_indices = @transform_3, window_bounds = array<i64: 1, 16, 16, 8>}]} {
    %cst = arith.constant 0.000000e+00 : f32
    %0 = vector.broadcast %cst : f32 to vector<256x8xf32>
    %c0 = arith.constant 0 : index
    %c0_0 = arith.constant 0 : index
    %c0_1 = arith.constant 0 : index
    %c0_2 = arith.constant 0 : index
    %1 = vector.load %arg2[%c0, %c0_0, %c0_1, %c0_2] : memref<1x16x16x4xbf16, #tpu.memory_space<vmem>>, vector<1x16x16x4xbf16>
    %2 = vector.shape_cast %1 : vector<1x16x16x4xbf16> to vector<16x16x4xbf16>
    %3 = vector.shape_cast %2 : vector<16x16x4xbf16> to vector<256x4xbf16>
    %c0_3 = arith.constant 0 : index
    %c0_4 = arith.constant 0 : index
    %c0_5 = arith.constant 0 : index
    %4 = vector.load %arg3[%c0_3, %c0_4, %c0_5] : memref<1x4x8xbf16, #tpu.memory_space<vmem>>, vector<1x4x8xbf16>
    %5 = vector.shape_cast %4 : vector<1x4x8xbf16> to vector<4x8xbf16>
    %cst_6 = arith.constant dense<0.000000e+00> : vector<256x8xf32>
    %6 = tpu.matmul %3, %5, %cst_6 {dimension_numbers = #tpu.dot_dimension_numbers<[1], [0], [0], [1], [0, 0, 1, 1], [], []>} : vector<256x4xbf16>, vector<4x8xbf16>, vector<256x8xf32> -> vector<256x8xf32>
    %7 = arith.addf %0, %6 : vector<256x8xf32>
    %c0_7 = arith.constant 0 : index
    %c0_8 = arith.constant 0 : index
    %8 = vector.load %arg4[%c0_7, %c0_8] : memref<1x8xf32, #tpu.memory_space<vmem>>, vector<1x8xf32>
    %9 = vector.broadcast %8 : vector<1x8xf32> to vector<256x8xf32>
    %10 = arith.addf %7, %9 : vector<256x8xf32>
    %cst_9 = arith.constant 0.000000e+00 : f32
    %11 = vector.broadcast %cst_9 : f32 to vector<256x8xf32>
    %12 = arith.maximumf %10, %11 : vector<256x8xf32>
    %13 = vector.shape_cast %12 : vector<256x8xf32> to vector<16x16x8xf32>
    %c0_10 = arith.constant 0 : index
    %c0_11 = arith.constant 0 : index
    %c0_12 = arith.constant 0 : index
    %c0_13 = arith.constant 0 : index
    %14 = vector.load %arg5[%c0_10, %c0_11, %c0_12, %c0_13] : memref<1x16x16x8xf32, #tpu.memory_space<vmem>>, vector<1x16x16x8xf32>
    %15 = vector.shape_cast %14 : vector<1x16x16x8xf32> to vector<16x16x8xf32>
    %16 = vector.shape_cast %13 : vector<16x16x8xf32> to vector<1x16x16x8xf32>
    tpu.vector_store %arg5[%c0_10, %c0_11, %c0_12, %c0_13], %16 {strides = array<i32>} : memref<1x16x16x8xf32, #tpu.memory_space<vmem>>, vector<1x16x16x8xf32>,
    return
  }
  func.func @transform_0(%arg0: i32, %arg1: i32) -> (i32, i32, i32, i32) {
    %c0_i32 = arith.constant 0 : i32
    %c0_i32_0 = arith.constant 0 : i32
    %c0_i32_1 = arith.constant 0 : i32
    %c0_i32_2 = arith.constant 0 : i32
    return %arg0, %c0_i32, %c0_i32_0, %c0_i32_1 : i32, i32, i32, i32
  }
  func.func @transform_1(%arg0: i32, %arg1: i32) -> (i32, i32, i32) {
    %c0_i32 = arith.constant 0 : i32
    %c0_i32_0 = arith.constant 0 : i32
    %c0_i32_1 = arith.constant 0 : i32
    return %c0_i32, %c0_i32_0, %arg1 : i32, i32, i32
  }
  func.func @transform_2(%arg0: i32, %arg1: i32) -> (i32, i32) {
    %c0_i32 = arith.constant 0 : i32
    %c0_i32_0 = arith.constant 0 : i32
    return %c0_i32, %arg1 : i32, i32
  }
  func.func @transform_3(%arg0: i32, %arg1: i32) -> (i32, i32, i32, i32) {
    %c0_i32 = arith.constant 0 : i32
    %c0_i32_0 = arith.constant 0 : i32
    %c0_i32_1 = arith.constant 0 : i32
    return %arg0, %c0_i32, %c0_i32_0, %arg1 : i32, i32, i32, i32
  }
}

</mosaic_0001>

<bundles_post_ra>
// kernel: tpu_custom_call.1
= control target key start
LH: loop header
LB: loop body
LE: loop exit
PB: predicated region body
PF: predicated region fallthrough
CT: control target
= control target key end

     0   :  { %8 = vsyncpa [#allocation3], 0  ;;  %s1562_s0 = inlined_call_operand.hbm [shape: bf16[2,16,16,4], index: 0, kind: input, shape index: {}]   ;;  %s1563_s1 = inlined_call_operand.hbm [shape: bf16[1,4,8], index: 1, kind: input, shape index: {}]   ;;  %s1564_s2 = inlined_call_operand.hbm [shape: f32[1,8], index: 2, kind: input, shape index: {}]   ;;  %s1565_s3 = inlined_call_operand.hbm [shape: f32[2,16,16,8], index: 3, kind: output, shape index: {}]  }
   0x1   :  { %10 = vsyncpa [#allocation3 + $0x1], 0 }
   0x2   :  { %11 = vsyncpa [#allocation6], 0 }
   0x3   :  { %12 = vsyncpa [#allocation4], 0 }
   0x4   :  { %14 = vsyncpa [#allocation4 + $0x1], 0  ;;  %s1177_s12 = smov 0   ;;  %s1179_s13 = smov 0  }
   0x5   :  { %s1181_s14 = smov 0   ;;  %s1183_s15 = smov 0  }
   0x6   :  { %s1185_s16 = smov 0   ;;  %s1187_s17 = smov 0  }
   0x7 LB: > { %s763_s18 = sadd.s32 4294967295, %s1147_s17   ;;  %s764_s19 = sadd.s32 4294967294, %s1147_s17   ;;  %s1147_s17 = sphi %s1187_s17, %s20_s17   ;;  %s1143_s16 = sphi %s1185_s16, %s1591_s16   ;;  %s1139_s15 = sphi %s1183_s15, %s1590_s15   ;;  %s1135_s14 = sphi %s1181_s14, %s1589_s14   ;;  %s1131_s13 = sphi %s1179_s13, %s1588_s13   ;;  %s1127_s12 = sphi %s1177_s12, %s1587_s12  }
   0x8   : > { %s39_s20 = sadd.s32 1, %s1135_s14  ;;  %p46_p0 = scmp.ne.s32.totalorder %s1135_s14, %s1131_s13 }
   0x9   : > { %p47_p1 = scmp.eq.s32.totalorder %s1147_s17, 0  ;;  %p52_p2 = scmp.ne.s32.totalorder %s1131_s13, %s1127_s12 }
   0xa   : > { %p1215_p3 = scmp.eq.s32.totalorder %s763_s18, 0  ;;  %p130_p4 = scmp.eq.s32.totalorder %s763_s18, 1 }
   0xb   : > { %p1219_p5 = por %p47_p1, %p46_p0  ;;  %p136_p6 = scmp.eq.s32.totalorder %s764_s19, 1 }
   0xc   : > { %s1572_s21 = scalar_select %p1215_p3, 1, 0 }
   0xd   : > { %p1225_p7 = por %p1215_p3, %p52_p2  ;;  %p1229_p8 = por %p130_p4, %p46_p0 }
   0xe   : > { %p1233_p9 = por %p136_p6, %p52_p2  ;;  %p765_p10 = scmp.ge.s32.totalorder %s1147_s17, 1 }
   0xf   : > { %s1574_s23 = scalar_select %p1225_p7, 1, 0 }
  0x10   : > { %s1575_s24 = scalar_select %p1229_p8, 1, 0 }
  0x11   : > { %s1576_s25 = scalar_select %p1233_p9, 1, 0 }
  0x12   : > { %p143_p11 = scmp.lt.s32.totalorder %s1147_s17, 3  ;;  %s1149_s27 = smov [#allocation5]  }
  0x13   : > { %s158_s28 = sshll.u32 %s1149_s27, 4  ;;  %p901_p1 = scmp.lt.s32.totalorder %s1147_s17, 2  ;;  %s159_s28 = int_to_ptr.vmem [resolvable:$true] %s158_s28 }
  0x14   : > { %p1240_p13 = pnand %p765_p10, %p143_p11  ;;  %s1150_s30 = smov [#allocation7]  }
  0x15   : > { %p1249_p4 = pnand %p901_p1, %p1219_p5  ;;  %s171_s4 = sshll.u32 %s1150_s30, 4  ;;  %s1259_s4 = int_to_ptr.vmem [resolvable:$true] %s171_s4 }
  0x16   : > { %s1577_s26 = scalar_select %p1240_p13, 1, 0 }
  0x17   : > { %p884_p0 = pneg %p1240_p13  ;;  %s975_s8 = scalar_lea.hbm %s1563_s1, 32 }
  0x18   : > { %s1578_s29 = scalar_select %p1249_p4, 1, 0 }
  0x19   : > { %p1255_p2 = pnand %p884_p0, %p1215_p3  ;;  %p976_p5 = scmp.ne.s32.totalorder %s1563_s1, %s975_s8 }
  0x1a   : > { %p982_p1 = scmp.lt.u32.totalorder %s975_s8, %s1563_s1 }
  0x1b   : > { %p977_p6 = pneg %p1255_p2 }
  0x1d   : > { %p978_p10 = pnand %p977_p6, %p976_p5 }
  0x1f   : > { %p979_p11 = pneg %p978_p10 }
  0x21   : > { %p984_p0 = pnand %p982_p1, %p979_p11 }
  0x23   : > { %987 = shalt.err (!%p984_p0)
}
  0x24   : > { %s988_s19 = scalar_lea.vmem %s159_s28, 32  ;;  %p996_p3 = scmp.lt.s32.totalorder %s159_s28, %s159_s28 }
  0x25   : > { %p989_p12 = scmp.ne.s32.totalorder %s159_s28, %s988_s19  ;;  %p997_p7 = scmp.lt.s32.totalorder %s988_s19, %s988_s19 }
  0x27   : > { %p991_p9 = pnand %p989_p12, %p977_p6  ;;  %p998_p13 = por %p997_p7, %p996_p3 }
  0x29   : > { %p992_p8 = pneg %p991_p9 }
  0x2b   : > { %p999_p4 = pnand %p998_p13, %p992_p8 }
  0x2d   : > { %1002 = shalt.err (!%p999_p4)
}
  0x2e   : > { %887 = dma.hbm_to_vmem [thread:$0]  (!%p1255_p2), %s1563_s1, 32, %s159_s28, [#allocation6]  }
  0x2f   : > { %s1003_s7 = scalar_lea.hbm %s1564_s2, 16 }
  0x30   : > { %p1004_p9 = scmp.ne.s32.totalorder %s1564_s2, %s1003_s7  ;;  %p1010_p8 = scmp.lt.u32.totalorder %s1003_s7, %s1564_s2 }
  0x32   : > { %p1006_p3 = pnand %p1004_p9, %p977_p6 }
  0x34   : > { %p1007_p7 = pneg %p1006_p3 }
  0x36   : > { %p1012_p12 = pnand %p1010_p8, %p1007_p7 }
  0x38   : > { %1015 = shalt.err (!%p1012_p12)
}
  0x39   : > { %s1016_s28 = scalar_lea.vmem %s1259_s4, 16  ;;  %s1023_s18 = scalar_lea.vmem %s1259_s4, 32 }
  0x3a   : > { %p1017_p13 = scmp.ne.s32.totalorder %s1259_s4, %s1016_s28  ;;  %p1024_p10 = scmp.lt.s32.totalorder %s1259_s4, %s1259_s4 }
  0x3b   : > { %p1025_p11 = scmp.lt.s32.totalorder %s1023_s18, %s1016_s28 }
  0x3c   : > { %p1019_p4 = pnand %p1017_p13, %p977_p6 }
  0x3d   : > { %p1026_p1 = por %p1025_p11, %p1024_p10 }
  0x3e   : > { %p1020_p5 = pneg %p1019_p4 }
  0x40   : > { %p1027_p0 = pnand %p1026_p1, %p1020_p5 }
  0x42   : > { %1030 = shalt.err (!%p1027_p0)
}
  0x43   : > { %890 = dma.hbm_to_vmem [thread:$0]  (!%p1255_p2), %s1564_s2, 16, %s1259_s4, [#allocation6]  }
  0x44   : > { %s32_s27 = sadd.s32 1, %s1143_s16  ;;  %s182_s30 = sand.u32 1, %s1135_s14  }
  0x45   : > { %p34_p6 = scmp.ge.s32.totalorder %s32_s27, 2  ;;  %s769_s6 = sshll.u32 %s182_s30, 7 }
  0x46   : > { %s815_s7 = sshll.u32 %s1143_s16, 11  ;;  %s186_s4 = scalar_lea.vmem [#allocation2], %s769_s6 }
  0x47   : > { %s1593_s27 = smov (%p34_p6, %s32_s27), 0  ;;  %s1317_s9 = scalar_lea.hbm %s1562_s0, %s815_s7 }
  0x48   : > { %s36_s10 = ssub.s32 %s1143_s16, %s1593_s27  ;;  %s193_s11 = sshll.u32 %s186_s4, 4  ;;  %s1321_s11 = int_to_ptr.vmem [resolvable:$true] %s193_s11 }
  0x49   : > { %p37_p2 = scmp.eq.s32.totalorder %s36_s10, 0  ;;  %s1328_s18 = scalar_lea.sflag [#allocation3], %s182_s30 }
  0x4a   : > { %s1031_s19 = scalar_lea.hbm %s1317_s9, 2048  ;;  %p1580_p3 = scmp.ne.s32.totalorder %s1578_s29, 0 }
  0x4b   : > { %s1326_s28 = scalar_select %p37_p2, %s1135_s14, %s39_s20  }
  0x4c   : > { %p1032_p9 = scmp.ne.s32.totalorder %s1317_s9, %s1031_s19  ;;  %p1033_p7 = pneg %p1580_p3 }
  0x4d   : > { %s1036_s6 = scalar_lea.hbm %s1562_s0, 4096  ;;  %p1037_p13 = scmp.lt.u32.totalorder %s1317_s9, %s1562_s0 }
  0x4e   : > { %p1034_p8 = pnand %p1033_p7, %p1032_p9  ;;  %p1038_p4 = scmp.lt.u32.totalorder %s1036_s6, %s1031_s19 }
  0x4f   : > { %p1040_p10 = scmp.lt.u32.totalorder %s1031_s19, %s1317_s9 }
  0x50   : > { %p1035_p12 = pneg %p1034_p8  ;;  %p1039_p5 = por %p1038_p4, %p1037_p13 }
  0x52   : > { %p1041_p11 = por %p1040_p10, %p1039_p5 }
  0x54   : > { %p1042_p1 = pnand %p1041_p11, %p1035_p12 }
  0x56   : > { %1045 = shalt.err (!%p1042_p1)
}
  0x57   : > { %s1046_s20 = scalar_lea.vmem %s1321_s11, 2048  ;;  %s1151_s30 = smov [#allocation2]  }
  0x58   : > { %p1047_p0 = scmp.ne.s32.totalorder %s1321_s11, %s1046_s20  ;;  %s1051_s10 = sshll.u32 %s1151_s30, 4  ;;  %s1052_s10 = int_to_ptr.vmem [resolvable:$false] %s1051_s10 }
  0x59   : > { %s1053_s4 = scalar_lea.vmem %s1052_s10, 4096  ;;  %p1054_p9 = scmp.lt.s32.totalorder %s1321_s11, %s1052_s10 }
  0x5a   : > { %p1049_p6 = pnand %p1047_p0, %p1033_p7  ;;  %p1055_p8 = scmp.lt.s32.totalorder %s1053_s4, %s1046_s20 }
  0x5c   : > { %p1050_p2 = pneg %p1049_p6  ;;  %p1056_p13 = por %p1055_p8, %p1054_p9 }
  0x5e   : > { %p1057_p4 = pnand %p1056_p13, %p1050_p2 }
  0x60   : > { %1060 = shalt.err (!%p1057_p4)
}
  0x61   : > { %s1152_s19 = smov 64   ;;  %s1153_s22 = smov 4  }
  0x62   : > { %894 = dma.hbm_to_vmem [thread:$0]  (!%p1580_p3), %s1317_s9, 2048, %s1321_s11, %s1328_s18, %s1152_s19, %s1152_s19, %s1153_s22  }
  0x63   : > { %p1581_p7 = scmp.ne.s32.totalorder %s1577_s26, 0 }
  0x64   : > { %s1359_s7 = sand.u32 (!%p1581_p7), 1, %s1131_s13   ;;  %p1582_p12 = scmp.ne.s32.totalorder (!%p1581_p7), %s1574_s23, 0 }
  0x65   : > { %205 = sbr.rel (%p1581_p7) target bundleno = 375 (0x177), region = 32  ;;  %s773_s6 = sshll.u32 (!%p1581_p7), %s1359_s7, 7 }
  0x66   : > { %s208_s5 = scalar_lea.sflag (!%p1581_p7), [#allocation3], %s1359_s7  ;;  %s1363_s8 = scalar_lea.vmem (!%p1581_p7), [#allocation2], %s773_s6 }
  0x6c   : > { %1114 = dma.done.wait (%p1582_p12), %s208_s5, 2048  }
  0x6d   : > { %1116 = vsyncadd (%p1582_p12), %s208_s5, 4294965248  ;;  %p1583_p3 = scmp.ne.s32.totalorder %s1572_s21, 0 }
  0x6f   : > { %1118 = dma.done.wait (%p1583_p3), [#allocation6], 48  }
  0x70   : > { %1120 = vsyncadd (%p1583_p3), [#allocation6], 4294967248  ;;  %vm412_vm0 = vcmask 1041408   ;;  %vm363_vm1 = vcmask 31744   ;;  %v275_v0 = vld [vmem:[#allocation5] sm:$0x3] }
  0x71   : > { %870 = vmatprep.subr.msk.bf16.mxu0 %vm412_vm0, %v275_v0  ;;  %871 = vmatprep.subr.msk.bf16.mxu1 %vm412_vm0, %v275_v0  ;;  %v414_v1 = vsel %vm412_vm0, %v275_v0, 0  ;;  %v959_v2 = vld [vmem:[%s1363_s8] sm:$0xff]   ;;  %v961_v4 = vld [vmem:[%s1363_s8 + $0x8] sm:$0xff]   ;;  %v963_v6 = vld [vmem:[%s1363_s8 + $0x10] sm:$0xff]   ;;  %s776_s21 = sshll.u32 %s1359_s7, 8  ;;  %vm609_vm2 = vcmask 64512  }
  0x72   : > { %835 = vmatpush3.bf16.msra.mxu0 %v414_v1  ;;  %869 = vmatpush3.bf16.msra.mxu1 %v414_v1  ;;  %v960_v3 = vld [vmem:[%s1363_s8 + $0x40] sm:$0xff]   ;;  %v962_v5 = vld [vmem:[%s1363_s8 + $0x48] sm:$0xff]   ;;  %v964_v7 = vld [vmem:[%s1363_s8 + $0x50] sm:$0xff]   ;;  %s1415_s23 = scalar_lea.vmem [#allocation8], %s776_s21  ;;  %s816_s26 = sshll.u32 %s1139_s15, 12 }
  0x73   : > { %836 = vmatprep.mubr.msk.bf16.mxu0 %vm363_vm1, %v959_v2  ;;  %852 = vmatprep.mubr.msk.bf16.mxu1 %vm363_vm1, %v960_v3  ;;  %v965_v8 = vld [vmem:[%s1363_s8 + $0x18] sm:$0xff]   ;;  %v967_v10 = vld [vmem:[%s1363_s8 + $0x20] sm:$0xff]   ;;  %v969_v12 = vld [vmem:[%s1363_s8 + $0x28] sm:$0xff]   ;;  %s657_s29 = sshll.u32 %s1415_s23, 4  ;;  %s1501_s11 = scalar_lea.hbm %s1565_s3, %s816_s26  ;;  %s1503_s29 = int_to_ptr.vmem [resolvable:$true] %s657_s29 }
  0x74   : > { %v966_v9 = vld [vmem:[%s1363_s8 + $0x58] sm:$0xff]   ;;  %v968_v11 = vld [vmem:[%s1363_s8 + $0x60] sm:$0xff]   ;;  %v970_v13 = vld [vmem:[%s1363_s8 + $0x68] sm:$0xff]   ;;  %s643_s18 = scalar_lea.sflag [#allocation4], %s1359_s7  ;;  %s1061_s20 = scalar_lea.vmem %s1503_s29, 4096 }
  0x75   : > { %837 = vmatmul.mubr.msk.bf16.vlgmr.msra.gmra.mrb[0].mxu0 %vm363_vm1, %v961_v4  ;;  %853 = vmatmul.mubr.msk.bf16.vlgmr.msra.gmra.mrb[0].mxu1 %vm363_vm1, %v962_v5  ;;  %v971_v14 = vld [vmem:[%s1363_s8 + $0x30] sm:$0xff]   ;;  %v973_v16 = vld [vmem:[%s1363_s8 + $0x38] sm:$0xff]   ;;  %v1405_v18 = vld [vmem:[#allocation7] ss:$0 sm:$0xff]  ;;  %p1062_p5 = scmp.ne.s32.totalorder %s1503_s29, %s1061_s20  ;;  %p1584_p10 = scmp.ne.s32.totalorder %s1575_s24, 0 }
  0x76   : > { %840 = vmatprep.mubr.msk.bf16.mxu0 %vm363_vm1, %v963_v6  ;;  %856 = vmatprep.mubr.msk.bf16.mxu1 %vm363_vm1, %v964_v7  ;;  %v972_v15 = vld [vmem:[%s1363_s8 + $0x70] sm:$0xff]   ;;  %v974_v17 = vld [vmem:[%s1363_s8 + $0x78] sm:$0xff]   ;;  %s1154_s30 = smov [#allocation8]  }
  0x77   : > { %p1063_p11 = pnand %p1062_p5, %p1584_p10  ;;  %s1065_s10 = sshll.u32 %s1154_s30, 4  ;;  %s1066_s10 = int_to_ptr.vmem [resolvable:$false] %s1065_s10 }
  0x78   : > { %s1067_s4 = scalar_lea.vmem %s1066_s10, 8192  ;;  %p1068_p0 = scmp.lt.s32.totalorder %s1503_s29, %s1066_s10 }
  0x79   : > { %p1064_p1 = pneg %p1063_p11  ;;  %p1069_p6 = scmp.lt.s32.totalorder %s1067_s4, %s1061_s20 }
  0x7b   : > { %p1070_p2 = por %p1069_p6, %p1068_p0 }
  0x7d   : > { %841 = vmatmul.mubr.msk.bf16.gmra.mrb[4].mxu0 %vm363_vm1, %v965_v8  ;;  %857 = vmatmul.mubr.msk.bf16.gmra.mrb[4].mxu1 %vm363_vm1, %v966_v9  ;;  %p1071_p9 = pnand %p1070_p2, %p1064_p1 }
  0x7e   : > { %844 = vmatprep.mubr.msk.bf16.mxu0 %vm363_vm1, %v967_v10  ;;  %860 = vmatprep.mubr.msk.bf16.mxu1 %vm363_vm1, %v968_v11 }
  0x85   : > { %845 = vmatmul.mubr.msk.bf16.gmra.mrb[8].mxu0 %vm363_vm1, %v969_v12  ;;  %861 = vmatmul.mubr.msk.bf16.gmra.mrb[8].mxu1 %vm363_vm1, %v970_v13 }
  0x86   : > { %848 = vmatprep.mubr.msk.bf16.mxu0 %vm363_vm1, %v971_v14  ;;  %864 = vmatprep.mubr.msk.bf16.mxu1 %vm363_vm1, %v972_v15 }
  0x8d   : > { %849 = vmatmul.mubr.msk.bf16.gmra.mrb[12].mxu0 %vm363_vm1, %v973_v16  ;;  %865 = vmatmul.mubr.msk.bf16.gmra.mrb[12].mxu1 %vm363_vm1, %v974_v17 }
 0x148   : > { %v838_v19 = vpop.f32.mrb[0].mxu0  ;;  %v854_v21 = vpop.f32.mrb[0].mxu1 }
 0x149   : > { %v459_v20 = vadd.f32 %v838_v19, %v1405_v18  ;;  %v450_v22 = vpop.f32.mrb[1].mxu0  ;;  %v523_v23 = vadd.f32 %v854_v21, %v1405_v18  ;;  %v514_v25 = vpop.f32.mrb[1].mxu1 }
 0x14a   : > { %v451_v24 = vadd.f32 %v1405_v18, %v450_v22  ;;  %v839_v26 = vpop.f32.mrb[2].mxu0  ;;  %v515_v28 = vadd.f32 %v1405_v18, %v514_v25  ;;  %v855_v30 = vpop.f32.mrb[2].mxu1 }
 0x14b   : > { %v579_v27 = vmax.f32 %v459_v20, 0.0  ;;  %v462_v29 = vadd.f32 %v839_v26, %v1405_v18  ;;  %v453_v31 = vpop.f32.mrb[3].mxu0  ;;  %v595_v32 = vmax.f32 %v523_v23, 0.0  ;;  %v526_v34 = vadd.f32 %v855_v30, %v1405_v18  ;;  %v517_v36 = vpop.f32.mrb[3].mxu1 }
 0x14c   : > { %v577_v33 = vmax.f32 %v451_v24, 0.0  ;;  %v454_v35 = vadd.f32 %v1405_v18, %v453_v31  ;;  %v593_v37 = vmax.f32 %v515_v28, 0.0  ;;  %v518_v39 = vadd.f32 %v1405_v18, %v517_v36 }
 0x14d   : > { %612 = vst.msk [vmem:[%s1415_s23 + $0x10] sm:$0xff] %vm609_vm2, %v579_v27  ;;  %v580_v38 = vmax.f32 %v462_v29, 0.0  ;;  %628 = vst.msk [vmem:[%s1415_s23 + $0x90] sm:$0xff] %vm609_vm2, %v595_v32  ;;  %v596_v40 = vmax.f32 %v526_v34, 0.0 }
 0x14e   : > { %610 = vst.msk [vmem:[%s1415_s23] sm:$0xff] %vm609_vm2, %v577_v33  ;;  %v578_v41 = vmax.f32 %v454_v35, 0.0  ;;  %626 = vst.msk [vmem:[%s1415_s23 + $0x80] sm:$0xff] %vm609_vm2, %v593_v37  ;;  %v594_v42 = vmax.f32 %v518_v39, 0.0 }
 0x14f   : > { %613 = vst.msk [vmem:[%s1415_s23 + $0x18] sm:$0xff] %vm609_vm2, %v580_v38  ;;  %629 = vst.msk [vmem:[%s1415_s23 + $0x98] sm:$0xff] %vm609_vm2, %v596_v40 }
 0x150   : > { %611 = vst.msk [vmem:[%s1415_s23 + $0x8] sm:$0xff] %vm609_vm2, %v578_v41  ;;  %v842_v43 = vpop.f32.mrb[4].mxu0  ;;  %627 = vst.msk [vmem:[%s1415_s23 + $0x88] sm:$0xff] %vm609_vm2, %v594_v42  ;;  %v858_v45 = vpop.f32.mrb[4].mxu1 }
 0x151   : > { %v475_v44 = vadd.f32 %v842_v43, %v1405_v18  ;;  %v466_v46 = vpop.f32.mrb[5].mxu0  ;;  %v539_v47 = vadd.f32 %v858_v45, %v1405_v18  ;;  %v530_v49 = vpop.f32.mrb[5].mxu1 }
 0x152   : > { %v467_v48 = vadd.f32 %v1405_v18, %v466_v46  ;;  %v843_v50 = vpop.f32.mrb[6].mxu0  ;;  %v531_v52 = vadd.f32 %v1405_v18, %v530_v49  ;;  %v859_v54 = vpop.f32.mrb[6].mxu1 }
 0x153   : > { %v583_v51 = vmax.f32 %v475_v44, 0.0  ;;  %v478_v53 = vadd.f32 %v843_v50, %v1405_v18  ;;  %v469_v55 = vpop.f32.mrb[7].mxu0  ;;  %v599_v56 = vmax.f32 %v539_v47, 0.0  ;;  %v542_v58 = vadd.f32 %v859_v54, %v1405_v18  ;;  %v533_v60 = vpop.f32.mrb[7].mxu1 }
 0x154   : > { %v581_v57 = vmax.f32 %v467_v48, 0.0  ;;  %v470_v59 = vadd.f32 %v1405_v18, %v469_v55  ;;  %v597_v61 = vmax.f32 %v531_v52, 0.0  ;;  %v534_v63 = vadd.f32 %v1405_v18, %v533_v60 }
 0x155   : > { %616 = vst.msk [vmem:[%s1415_s23 + $0x30] sm:$0xff] %vm609_vm2, %v583_v51  ;;  %v584_v62 = vmax.f32 %v478_v53, 0.0  ;;  %632 = vst.msk [vmem:[%s1415_s23 + $0xb0] sm:$0xff] %vm609_vm2, %v599_v56  ;;  %v600_v0 = vmax.f32 %v542_v58, 0.0 }
 0x156   : > { %614 = vst.msk [vmem:[%s1415_s23 + $0x20] sm:$0xff] %vm609_vm2, %v581_v57  ;;  %v582_v1 = vmax.f32 %v470_v59, 0.0  ;;  %630 = vst.msk [vmem:[%s1415_s23 + $0xa0] sm:$0xff] %vm609_vm2, %v597_v61  ;;  %v598_v2 = vmax.f32 %v534_v63, 0.0 }
 0x157   : > { %617 = vst.msk [vmem:[%s1415_s23 + $0x38] sm:$0xff] %vm609_vm2, %v584_v62  ;;  %633 = vst.msk [vmem:[%s1415_s23 + $0xb8] sm:$0xff] %vm609_vm2, %v600_v0 }
 0x158   : > { %615 = vst.msk [vmem:[%s1415_s23 + $0x28] sm:$0xff] %vm609_vm2, %v582_v1  ;;  %v846_v3 = vpop.f32.mrb[8].mxu0  ;;  %631 = vst.msk [vmem:[%s1415_s23 + $0xa8] sm:$0xff] %vm609_vm2, %v598_v2  ;;  %v862_v5 = vpop.f32.mrb[8].mxu1 }
 0x159   : > { %v491_v4 = vadd.f32 %v846_v3, %v1405_v18  ;;  %v482_v6 = vpop.f32.mrb[9].mxu0  ;;  %v555_v7 = vadd.f32 %v862_v5, %v1405_v18  ;;  %v546_v9 = vpop.f32.mrb[9].mxu1 }
 0x15a   : > { %v483_v8 = vadd.f32 %v1405_v18, %v482_v6  ;;  %v847_v10 = vpop.f32.mrb[10].mxu0  ;;  %v547_v12 = vadd.f32 %v1405_v18, %v546_v9  ;;  %v863_v14 = vpop.f32.mrb[10].mxu1 }
 0x15b   : > { %v587_v11 = vmax.f32 %v491_v4, 0.0  ;;  %v494_v13 = vadd.f32 %v847_v10, %v1405_v18  ;;  %v485_v15 = vpop.f32.mrb[11].mxu0  ;;  %v603_v16 = vmax.f32 %v555_v7, 0.0  ;;  %v558_v19 = vadd.f32 %v863_v14, %v1405_v18  ;;  %v549_v21 = vpop.f32.mrb[11].mxu1 }
 0x15c   : > { %v585_v17 = vmax.f32 %v483_v8, 0.0  ;;  %v486_v20 = vadd.f32 %v1405_v18, %v485_v15  ;;  %v601_v22 = vmax.f32 %v547_v12, 0.0  ;;  %v550_v24 = vadd.f32 %v1405_v18, %v549_v21 }
 0x15d   : > { %620 = vst.msk [vmem:[%s1415_s23 + $0x50] sm:$0xff] %vm609_vm2, %v587_v11  ;;  %v588_v23 = vmax.f32 %v494_v13, 0.0  ;;  %636 = vst.msk [vmem:[%s1415_s23 + $0xd0] sm:$0xff] %vm609_vm2, %v603_v16  ;;  %v604_v25 = vmax.f32 %v558_v19, 0.0 }
 0x15e   : > { %618 = vst.msk [vmem:[%s1415_s23 + $0x40] sm:$0xff] %vm609_vm2, %v585_v17  ;;  %v586_v26 = vmax.f32 %v486_v20, 0.0  ;;  %634 = vst.msk [vmem:[%s1415_s23 + $0xc0] sm:$0xff] %vm609_vm2, %v601_v22  ;;  %v602_v27 = vmax.f32 %v550_v24, 0.0 }
 0x15f   : > { %621 = vst.msk [vmem:[%s1415_s23 + $0x58] sm:$0xff] %vm609_vm2, %v588_v23  ;;  %637 = vst.msk [vmem:[%s1415_s23 + $0xd8] sm:$0xff] %vm609_vm2, %v604_v25 }
 0x160   : > { %619 = vst.msk [vmem:[%s1415_s23 + $0x48] sm:$0xff] %vm609_vm2, %v586_v26  ;;  %v850_v28 = vpop.f32.mrb[12].mxu0  ;;  %635 = vst.msk [vmem:[%s1415_s23 + $0xc8] sm:$0xff] %vm609_vm2, %v602_v27  ;;  %v866_v30 = vpop.f32.mrb[12].mxu1 }
 0x161   : > { %v507_v29 = vadd.f32 %v850_v28, %v1405_v18  ;;  %v498_v31 = vpop.f32.mrb[13].mxu0  ;;  %v571_v32 = vadd.f32 %v866_v30, %v1405_v18  ;;  %v562_v34 = vpop.f32.mrb[13].mxu1 }
 0x162   : > { %v499_v33 = vadd.f32 %v1405_v18, %v498_v31  ;;  %v851_v35 = vpop.f32.mrb[14].mxu0  ;;  %v563_v37 = vadd.f32 %v1405_v18, %v562_v34  ;;  %v867_v39 = vpop.f32.mrb[14].mxu1 }
 0x163   : > { %v591_v36 = vmax.f32 %v507_v29, 0.0  ;;  %v510_v38 = vadd.f32 %v851_v35, %v1405_v18  ;;  %v501_v40 = vpop.f32.mrb[15].mxu0  ;;  %v607_v41 = vmax.f32 %v571_v32, 0.0  ;;  %v574_v43 = vadd.f32 %v867_v39, %v1405_v18  ;;  %v565_v45 = vpop.f32.mrb[15].mxu1 }
 0x164   : > { %v589_v42 = vmax.f32 %v499_v33, 0.0  ;;  %v502_v44 = vadd.f32 %v1405_v18, %v501_v40  ;;  %v605_v46 = vmax.f32 %v563_v37, 0.0  ;;  %v566_v48 = vadd.f32 %v1405_v18, %v565_v45 }
 0x165   : > { %624 = vst.msk [vmem:[%s1415_s23 + $0x70] sm:$0xff] %vm609_vm2, %v591_v36  ;;  %v592_v47 = vmax.f32 %v510_v38, 0.0  ;;  %640 = vst.msk [vmem:[%s1415_s23 + $0xf0] sm:$0xff] %vm609_vm2, %v607_v41  ;;  %v608_v49 = vmax.f32 %v574_v43, 0.0 }
 0x166   : > { %622 = vst.msk [vmem:[%s1415_s23 + $0x60] sm:$0xff] %vm609_vm2, %v589_v42  ;;  %v590_v50 = vmax.f32 %v502_v44, 0.0  ;;  %638 = vst.msk [vmem:[%s1415_s23 + $0xe0] sm:$0xff] %vm609_vm2, %v605_v46  ;;  %v606_v18 = vmax.f32 %v566_v48, 0.0 }
 0x167   : > { %625 = vst.msk [vmem:[%s1415_s23 + $0x78] sm:$0xff] %vm609_vm2, %v592_v47  ;;  %641 = vst.msk [vmem:[%s1415_s23 + $0xf8] sm:$0xff] %vm609_vm2, %v608_v49 }
 0x168   : > { %623 = vst.msk [vmem:[%s1415_s23 + $0x68] sm:$0xff] %vm609_vm2, %v590_v50  ;;  %639 = vst.msk [vmem:[%s1415_s23 + $0xe8] sm:$0xff] %vm609_vm2, %v606_v18 }
 0x169   : > { %1074 = shalt.err (!%p1071_p9)
}
 0x16a   : > { %s1075_s19 = scalar_lea.hbm %s1501_s11, 4096  ;;  %s1079_s5 = scalar_lea.hbm %s1565_s3, 8192 }
 0x16b   : > { %p1076_p8 = scmp.ne.s32.totalorder %s1501_s11, %s1075_s19  ;;  %p1080_p7 = scmp.lt.u32.totalorder %s1501_s11, %s1565_s3 }
 0x16c   : > { %p1081_p12 = scmp.lt.u32.totalorder %s1079_s5, %s1075_s19  ;;  %p1083_p5 = scmp.lt.u32.totalorder %s1075_s19, %s1501_s11 }
 0x16d   : > { %p1077_p13 = pnand %p1076_p8, %p1584_p10 }
 0x16e   : > { %p1082_p3 = por %p1081_p12, %p1080_p7 }
 0x16f   : > { %p1078_p4 = pneg %p1077_p13 }
 0x170   : > { %p1084_p11 = por %p1083_p5, %p1082_p3 }
 0x172   : > { %p1085_p1 = pnand %p1084_p11, %p1078_p4 }
 0x174   : > { %1088 = shalt.err (!%p1085_p1)
}
 0x175   : > { %s1155_s23 = smov 128   ;;  %s1156_s26 = smov 8  }
 0x176   : > { %882 = dma.vmem_to_hbm [thread:$0]  (%p1584_p10), %s1503_s29, 4096, %s1501_s11, %s643_s18, %s1155_s23, %s1155_s23, %s1156_s26  }
 0x177 PF: > { %s672_s15 = sand.u32 1, %s1127_s12   ;;  %p1585_p0 = scmp.ne.s32.totalorder %s1576_s25, 0 }
 0x178   : > { %p1586_p6 = scmp.ge.s32.totalorder %s1147_s17, 2  ;;  %s673_s9 = scalar_lea.sflag [#allocation4], %s672_s15 }
 0x17a   : > { %p896_p2 = pnand %p1586_p6, %p1585_p0 }
 0x17c   : > { %1122 = dma.done.wait (!%p896_p2), %s673_s9, 4096  }
 0x17d   : > { %1124 = vsyncadd (!%p896_p2), %s673_s9, 4294963200  ;;  %s20_s17 = sadd.s32 1, %s1147_s17   ;;  %s1587_s12 = smov %s1131_s13 }
 0x17e   : > { %p17_p9 = scmp.ge.s32.totalorder %s20_s17, 4   ;;  %s1588_s13 = smov %s1135_s14 }
 0x17f   : > { %s1589_s14 = smov %s1326_s28  ;;  %s1590_s15 = smov %s1143_s16 }
 0x180   : > { %s1591_s16 = smov %s1593_s27  ;;  %19 = sbr.rel (!%p17_p9) target bundleno = 7 (0x7), region = 87 }
 0x187   :  { %678 = vsyncpa [#allocation3], 1 }
 0x188   :  { %680 = vsyncpa [#allocation3 + $0x1], 1 }
 0x189   :  { %681 = vsyncpa [#allocation6], 1 }
 0x18a   :  { %682 = vsyncpa [#allocation4], 1 }
 0x18b   :  { %684 = vsyncpa [#allocation4 + $0x1], 1 }

</bundles_post_ra>
